<compile_context>
chip_gen: v7x
topology: tpu7x:2x2x1
jax: 0.10.0
libtpu: 0.0.40
codegen_flags: <defaults>
</compile_context>

<pallas_src>
import jax
import jax.numpy as jnp
from jax.experimental import pallas as pl
from jax.experimental.pallas import tpu as pltpu


def _round_up(x, m):
    return (x + m - 1) // m * m


def _cdiv(a, b):
    return (a + b - 1) // b


def policy_mlp_kernel(x_ref, w1_ref, b1_ref, w2_ref, b2_ref, w3_ref, b3_ref, o_ref):
    # Cast activations to bf16 in-kernel (cheap VPU pack), keep f32 MXU accum.
    x = x_ref[...].astype(jnp.bfloat16)

    # fc1 + ReLU
    h1 = jnp.dot(x, w1_ref[...], preferred_element_type=jnp.float32)
    h1 = jnp.maximum(h1 + b1_ref[...], 0.0)

    # fc2 + ReLU
    h2 = jnp.dot(h1.astype(jnp.bfloat16), w2_ref[...],
                 preferred_element_type=jnp.float32)
    h2 = jnp.maximum(h2 + b2_ref[...], 0.0)

    # fc3 + Tanh  (true 4-wide output; no lane padding of the stored result)
    h3 = jnp.dot(h2.astype(jnp.bfloat16), w3_ref[...],
                 preferred_element_type=jnp.float32)
    o_ref[...] = jnp.tanh(h3 + b3_ref[...]).astype(o_ref.dtype)


def prepare_params(params):
    """Convert f32 [in, out] params into kernel layout:
    bf16 weights, f32 (1, N) biases."""
    w1, b1, w2, b2, w3, b3 = params
    return (
        w1.astype(jnp.bfloat16),                    # (256, 256)
        b1.reshape(1, -1).astype(jnp.float32),      # (1, 256)
        w2.astype(jnp.bfloat16),                    # (256, 128)
        b2.reshape(1, -1).astype(jnp.float32),      # (1, 128)
        w3.astype(jnp.bfloat16),                    # (128, 4)
        b3.reshape(1, -1).astype(jnp.float32),      # (1, 4)
    )


def policy_model_forward(x, prepared_params, block_b=1024):
    """x: [B, 256] float32. Returns [B, 4] float32."""
    w1, b1, w2, b2, w3, b3 = prepared_params
    B = x.shape[0]

    # Batch block: 8-aligned (x is f32 at the boundary), big enough to
    # amortize per-step overhead.  If a large batch would fit in a single
    # block, split it in two so the "parallel" grid axis actually spans both
    # TensorCores on v7x.
    B8 = _round_up(B, 8)
    bb = min(block_b, B8)
    if bb == B8 and B8 >= 512:
        bb = _round_up(_cdiv(B8, 2), 8)
    Bp = _round_up(B, bb)

    xp = x
    if Bp != B:
        xp = jnp.pad(x, ((0, Bp - B), (0, 0)))

    grid = (Bp // bb,)

    out_padded = pl.pallas_call(
        policy_mlp_kernel,
        out_shape=jax.ShapeDtypeStruct((Bp, 4), jnp.float32),
        grid=grid,
        in_specs=[
            pl.BlockSpec((bb, 256), lambda i: (i, 0)),    # x: streamed per block
            pl.BlockSpec((256, 256), lambda i: (0, 0)),   # w1: VMEM-resident
            pl.BlockSpec((1, 256),  lambda i: (0, 0)),    # b1
            pl.BlockSpec((256, 128), lambda i: (0, 0)),   # w2
            pl.BlockSpec((1, 128),  lambda i: (0, 0)),    # b2
            pl.BlockSpec((128, 4),  lambda i: (0, 0)),    # w3
            pl.BlockSpec((1, 4),    lambda i: (0, 0)),    # b3
        ],
        out_specs=pl.BlockSpec((bb, 4), lambda i: (i, 0)),
        compiler_params=pltpu.CompilerParams(
            dimension_semantics=("parallel",),            # shard batch on v7x's 2 TCs
        ),
    )(xp, w1, b1, w2, b2, w3, b3)

    return out_padded[:B]


def init_params(key):
    """Deterministic synthetic parameters matching PolicyModel's shapes.

    PyTorch nn.Linear stores weight as [out, in]; we keep [in, out] so the
    kernel can do x @ W directly."""
    k1, k2, k3, k4, k5, k6 = jax.random.split(key, 6)
    scale = 0.05
    w1 = scale * jax.random.normal(k1, (256, 256), jnp.float32)
    b1 = scale * jax.random.normal(k2, (256,), jnp.float32)
    w2 = scale * jax.random.normal(k3, (256, 128), jnp.float32)
    b2 = scale * jax.random.normal(k4, (128,), jnp.float32)
    w3 = scale * jax.random.normal(k5, (128, 4), jnp.float32)
    b3 = scale * jax.random.normal(k6, (4,), jnp.float32)
    return (w1, b1, w2, b2, w3, b3)


def reference_forward(x, params):
    w1, b1, w2, b2, w3, b3 = params
    h = jnp.maximum(x @ w1 + b1, 0.0)
    h = jnp.maximum(h @ w2 + b2, 0.0)
    return jnp.tanh(h @ w3 + b3)


if __name__ == "__main__":
    key = jax.random.PRNGKey(0)
    kx, kp = jax.random.split(key)
    batch = 8
    x = jax.random.normal(kx, (batch, 256), jnp.float32)
    params = init_params(kp)
    prepared = prepare_params(params)

    out = policy_model_forward(x, prepared)
    out = jax.block_until_ready(out)

    ref = reference_forward(x, params)
    assert out.shape == (batch, 4), out.shape
    # bf16 matmul inputs with f32 accumulation vs. a full-f32 reference:
    # tolerance consistent with bf16 mantissa precision.
    assert jnp.allclose(out, ref, atol=3e-2, rtol=3e-2), "mismatch vs. reference"

    print("KERNEL_OK")
</pallas_src>

<mosaic_0001>
module attributes {stable_mosaic.version = 11 : i64} {
  func.func @policy_mlp_kernel(%arg0: i32, %arg1: memref<8x256xf32, #tpu.memory_space<vmem>>, %arg2: memref<256x256xbf16, #tpu.memory_space<vmem>>, %arg3: memref<1x256xf32, #tpu.memory_space<vmem>>, %arg4: memref<256x128xbf16, #tpu.memory_space<vmem>>, %arg5: memref<1x128xf32, #tpu.memory_space<vmem>>, %arg6: memref<128x4xbf16, #tpu.memory_space<vmem>>, %arg7: memref<1x4xf32, #tpu.memory_space<vmem>>, %arg8: memref<8x4xf32, #tpu.memory_space<vmem>>) attributes {dimension_semantics = [#tpu.dimension_semantics<parallel>], iteration_bounds = array<i64: 1>, scalar_prefetch = 0 : i64, scratch_operands = 0 : i64, tpu.core_type = #tpu.core_type<tc>, window_params = [{transform_indices = @transform_0, window_bounds = array<i64: 8, 256>}, {pipeline_mode = #tpu.pipeline_mode<synchronous>, transform_indices = @transform_1, window_bounds = array<i64: 256, 256>}, {pipeline_mode = #tpu.pipeline_mode<synchronous>, transform_indices = @transform_2, window_bounds = array<i64: 1, 256>}, {pipeline_mode = #tpu.pipeline_mode<synchronous>, transform_indices = @transform_3, window_bounds = array<i64: 256, 128>}, {pipeline_mode = #tpu.pipeline_mode<synchronous>, transform_indices = @transform_4, window_bounds = array<i64: 1, 128>}, {pipeline_mode = #tpu.pipeline_mode<synchronous>, transform_indices = @transform_5, window_bounds = array<i64: 128, 4>}, {pipeline_mode = #tpu.pipeline_mode<synchronous>, transform_indices = @transform_6, window_bounds = array<i64: 1, 4>}, {transform_indices = @transform_7, window_bounds = array<i64: 8, 4>}]} {
    %c0 = arith.constant 0 : index
    %c0_0 = arith.constant 0 : index
    %0 = vector.load %arg1[%c0, %c0_0] : memref<8x256xf32, #tpu.memory_space<vmem>>, vector<8x256xf32>
    %1 = arith.truncf %0 : vector<8x256xf32> to vector<8x256xbf16>
    %c0_1 = arith.constant 0 : index
    %c0_2 = arith.constant 0 : index
    %2 = vector.load %arg2[%c0_1, %c0_2] : memref<256x256xbf16, #tpu.memory_space<vmem>>, vector<256x256xbf16>
    %cst = arith.constant dense<0.000000e+00> : vector<8x256xf32>
    %3 = tpu.matmul %1, %2, %cst {dimension_numbers = #tpu.dot_dimension_numbers<[1], [0], [0], [1], [0, 0, 1, 1], [], []>} : vector<8x256xbf16>, vector<256x256xbf16>, vector<8x256xf32> -> vector<8x256xf32>
    %c0_3 = arith.constant 0 : index
    %c0_4 = arith.constant 0 : index
    %4 = vector.load %arg3[%c0_3, %c0_4] : memref<1x256xf32, #tpu.memory_space<vmem>>, vector<1x256xf32>
    %5 = vector.broadcast %4 : vector<1x256xf32> to vector<8x256xf32>
    %6 = arith.addf %3, %5 : vector<8x256xf32>
    %cst_5 = arith.constant 0.000000e+00 : f32
    %7 = vector.broadcast %cst_5 : f32 to vector<8x256xf32>
    %8 = arith.maximumf %6, %7 : vector<8x256xf32>
    %9 = arith.truncf %8 : vector<8x256xf32> to vector<8x256xbf16>
    %c0_6 = arith.constant 0 : index
    %c0_7 = arith.constant 0 : index
    %10 = vector.load %arg4[%c0_6, %c0_7] : memref<256x128xbf16, #tpu.memory_space<vmem>>, vector<256x128xbf16>
    %cst_8 = arith.constant dense<0.000000e+00> : vector<8x128xf32>
    %11 = tpu.matmul %9, %10, %cst_8 {dimension_numbers = #tpu.dot_dimension_numbers<[1], [0], [0], [1], [0, 0, 1, 1], [], []>} : vector<8x256xbf16>, vector<256x128xbf16>, vector<8x128xf32> -> vector<8x128xf32>
    %c0_9 = arith.constant 0 : index
    %c0_10 = arith.constant 0 : index
    %12 = vector.load %arg5[%c0_9, %c0_10] : memref<1x128xf32, #tpu.memory_space<vmem>>, vector<1x128xf32>
    %13 = vector.broadcast %12 : vector<1x128xf32> to vector<8x128xf32>
    %14 = arith.addf %11, %13 : vector<8x128xf32>
    %cst_11 = arith.constant 0.000000e+00 : f32
    %15 = vector.broadcast %cst_11 : f32 to vector<8x128xf32>
    %16 = arith.maximumf %14, %15 : vector<8x128xf32>
    %17 = arith.truncf %16 : vector<8x128xf32> to vector<8x128xbf16>
    %c0_12 = arith.constant 0 : index
    %c0_13 = arith.constant 0 : index
    %18 = vector.load %arg6[%c0_12, %c0_13] : memref<128x4xbf16, #tpu.memory_space<vmem>>, vector<128x4xbf16>
    %cst_14 = arith.constant dense<0.000000e+00> : vector<8x4xf32>
    %19 = tpu.matmul %17, %18, %cst_14 {dimension_numbers = #tpu.dot_dimension_numbers<[1], [0], [0], [1], [0, 0, 1, 1], [], []>} : vector<8x128xbf16>, vector<128x4xbf16>, vector<8x4xf32> -> vector<8x4xf32>
    %c0_15 = arith.constant 0 : index
    %c0_16 = arith.constant 0 : index
    %20 = vector.load %arg7[%c0_15, %c0_16] : memref<1x4xf32, #tpu.memory_space<vmem>>, vector<1x4xf32>
    %21 = vector.broadcast %20 : vector<1x4xf32> to vector<8x4xf32>
    %22 = arith.addf %19, %21 : vector<8x4xf32>
    %23 = math.tanh %22 : vector<8x4xf32>
    %c0_17 = arith.constant 0 : index
    %c0_18 = arith.constant 0 : index
    %24 = vector.load %arg8[%c0_17, %c0_18] : memref<8x4xf32, #tpu.memory_space<vmem>>, vector<8x4xf32>
    tpu.vector_store %arg8[%c0_17, %c0_18], %23 {strides = array<i32>} : memref<8x4xf32, #tpu.memory_space<vmem>>, vector<8x4xf32>,
    return
  }
  func.func @transform_0(%arg0: i32) -> (i32, i32) {
    %c0_i32 = arith.constant 0 : i32
    %c0_i32_0 = arith.constant 0 : i32
    return %arg0, %c0_i32 : i32, i32
  }
  func.func @transform_1(%arg0: i32) -> (i32, i32) {
    %c0_i32 = arith.constant 0 : i32
    %c0_i32_0 = arith.constant 0 : i32
    %c0_i32_1 = arith.constant 0 : i32
    return %c0_i32, %c0_i32_0 : i32, i32
  }
  func.func @transform_2(%arg0: i32) -> (i32, i32) {
    %c0_i32 = arith.constant 0 : i32
    %c0_i32_0 = arith.constant 0 : i32
    %c0_i32_1 = arith.constant 0 : i32
    return %c0_i32, %c0_i32_0 : i32, i32
  }
  func.func @transform_3(%arg0: i32) -> (i32, i32) {
    %c0_i32 = arith.constant 0 : i32
    %c0_i32_0 = arith.constant 0 : i32
    %c0_i32_1 = arith.constant 0 : i32
    return %c0_i32, %c0_i32_0 : i32, i32
  }
  func.func @transform_4(%arg0: i32) -> (i32, i32) {
    %c0_i32 = arith.constant 0 : i32
    %c0_i32_0 = arith.constant 0 : i32
    %c0_i32_1 = arith.constant 0 : i32
    return %c0_i32, %c0_i32_0 : i32, i32
  }
  func.func @transform_5(%arg0: i32) -> (i32, i32) {
    %c0_i32 = arith.constant 0 : i32
    %c0_i32_0 = arith.constant 0 : i32
    %c0_i32_1 = arith.constant 0 : i32
    return %c0_i32, %c0_i32_0 : i32, i32
  }
  func.func @transform_6(%arg0: i32) -> (i32, i32) {
    %c0_i32 = arith.constant 0 : i32
    %c0_i32_0 = arith.constant 0 : i32
    %c0_i32_1 = arith.constant 0 : i32
    return %c0_i32, %c0_i32_0 : i32, i32
  }
  func.func @transform_7(%arg0: i32) -> (i32, i32) {
    %c0_i32 = arith.constant 0 : i32
    %c0_i32_0 = arith.constant 0 : i32
    return %arg0, %c0_i32 : i32, i32
  }
}

</mosaic_0001>

<bundles_post_ra>
// kernel: tpu_custom_call.1
= control target key start
LH: loop header
LB: loop body
LE: loop exit
PB: predicated region body
PF: predicated region fallthrough
CT: control target
= control target key end

     0   :  { %12 = vsyncpa [#allocation3], 0  ;;  %s958_s0 = inlined_call_operand.vmem [shape: f32[8,256], index: 0, kind: input, shape index: {}]   ;;  %s959_s1 = inlined_call_operand.hbm [shape: bf16[256,256], index: 1, kind: input, shape index: {}]   ;;  %s960_s2 = inlined_call_operand.vmem [shape: f32[1,256], index: 2, kind: input, shape index: {}]   ;;  %s961_s3 = inlined_call_operand.hbm [shape: bf16[256,128], index: 3, kind: input, shape index: {}]   ;;  %s962_s4 = inlined_call_operand.vmem [shape: f32[1,128], index: 4, kind: input, shape index: {}]   ;;  %s963_s5 = inlined_call_operand.vmem [shape: bf16[128,4], index: 5, kind: input, shape index: {}]   ;;  %s964_s6 = inlined_call_operand.vmem [shape: f32[1,4], index: 6, kind: input, shape index: {}]   ;;  %s965_s7 = inlined_call_operand.vmem [shape: f32[8,4], index: 7, kind: output, shape index: {}]  }
   0x1   :  { %13 = vsyncpa [#allocation5], 0  ;;  %s844_s24 = smov [#allocation2]   ;;  %s796_s28 = scalar_lea.hbm %s959_s1, 4096 }
   0x2   :  { %s21_s25 = sshll.u32 %s844_s24, 4  ;;  %p797_p0 = scmp.ne.s32.totalorder %s959_s1, %s796_s28  ;;  %s22_s25 = int_to_ptr.vmem [resolvable:$true] %s21_s25 }
   0x3   :  { %p800_p1 = scmp.lt.u32.totalorder %s796_s28, %s959_s1 }
   0x5   :  { %p802_p2 = pnand %p800_p1, %p797_p0 }
   0x7   :  { %805 = shalt.err (!%p802_p2)
}
   0x8   :  { %s806_s10 = scalar_lea.vmem %s22_s25, 4096  ;;  %p811_p4 = scmp.lt.s32.totalorder %s22_s25, %s22_s25 }
   0x9   :  { %p807_p3 = scmp.ne.s32.totalorder %s22_s25, %s806_s10  ;;  %p812_p5 = scmp.lt.s32.totalorder %s806_s10, %s806_s10 }
   0xb   :  { %p813_p6 = por %p812_p5, %p811_p4 }
   0xd   :  { %p814_p7 = pnand %p813_p6, %p807_p3 }
   0xf   :  { %817 = shalt.err (!%p814_p7)
}
  0x10   :  { %s845_s11 = smov 128   ;;  %s846_s12 = smov 8  }
  0x11   :  { %27 = dma.hbm_to_vmem [thread:$0]  %s959_s1, 4096, %s22_s25, [#allocation3], %s845_s11, %s845_s11, %s846_s12  }
  0x12   :  { %s847_s15 = smov [#allocation4]   ;;  %s818_s19 = scalar_lea.hbm %s961_s3, 2048 }
  0x13   :  { %s35_s16 = sshll.u32 %s847_s15, 4  ;;  %p819_p8 = scmp.ne.s32.totalorder %s961_s3, %s818_s19  ;;  %s36_s16 = int_to_ptr.vmem [resolvable:$true] %s35_s16 }
  0x14   :  { %p822_p9 = scmp.lt.u32.totalorder %s818_s19, %s961_s3 }
  0x16   :  { %p824_p10 = pnand %p822_p9, %p819_p8 }
  0x18   :  { %827 = shalt.err (!%p824_p10)
}
  0x19   :  { %s828_s24 = scalar_lea.vmem %s36_s16, 2048  ;;  %p833_p12 = scmp.lt.s32.totalorder %s36_s16, %s36_s16 }
  0x1a   :  { %p829_p11 = scmp.ne.s32.totalorder %s36_s16, %s828_s24  ;;  %p834_p13 = scmp.lt.s32.totalorder %s828_s24, %s828_s24 }
  0x1c   :  { %p835_p0 = por %p834_p13, %p833_p12 }
  0x1e   :  { %p836_p1 = pnand %p835_p0, %p829_p11 }
  0x20   :  { %839 = shalt.err (!%p836_p1)
}
  0x21   :  { %s848_s1 = smov 64   ;;  %s849_s25 = smov 4  }
  0x22   :  { %41 = dma.hbm_to_vmem [thread:$0]  %s961_s3, 2048, %s36_s16, [#allocation5], %s848_s1, %s848_s1, %s849_s25  }
  0x23   :  { %840 = dma.done.wait [#allocation3], 4096  }
  0x24   :  { %841 = vsyncadd [#allocation3], 4294963200 }
  0x25   :  { %842 = dma.done.wait [#allocation5], 2048  }
  0x26   :  { %843 = vsyncadd [#allocation5], 4294965248  ;;  %v722_v0 = vld [vmem:[#allocation2 + $0x4] ss:$8 sps:$4 sm:$0xff]   ;;  %v724_v1 = vld [vmem:[#allocation2] ss:$8 sps:$4 sm:$0xff]   ;;  %v93_v53 = vlaneseq }
  0x27   :  { %263 = vmatprep.subr.bf16.mxu0 %v722_v0  ;;  %v725_v2 = vld [vmem:[#allocation2 + $0x14] ss:$8 sps:$4 sm:$0xff]   ;;  %v727_v3 = vld [vmem:[#allocation2 + $0x10] ss:$8 sps:$4 sm:$0xff]   ;;  %v728_v4 = vld [vmem:[#allocation2 + $0x24] ss:$8 sps:$4 sm:$0xff]  }
  0x28   :  { %264 = vmatpush1.bf16.msra.mxu0 %v724_v1  ;;  %v730_v5 = vld [vmem:[#allocation2 + $0x20] ss:$8 sps:$4 sm:$0xff]   ;;  %v731_v6 = vld [vmem:[#allocation2 + $0x34] ss:$8 sps:$4 sm:$0xff]   ;;  %v733_v7 = vld [vmem:[#allocation2 + $0x30] ss:$8 sps:$4 sm:$0xff]  }
  0x29   :  { %265 = vmatprep.subr.bf16.mxu0 %v725_v2  ;;  %v734_v8 = vld [vmem:[#allocation2 + $0x44] ss:$8 sps:$4 sm:$0xff]   ;;  %v736_v9 = vld [vmem:[#allocation2 + $0x40] ss:$8 sps:$4 sm:$0xff]   ;;  %v737_v10 = vld [vmem:[#allocation2 + $0x54] ss:$8 sps:$4 sm:$0xff]  }
  0x2a   :  { %v739_v11 = vld [vmem:[#allocation2 + $0x50] ss:$8 sps:$4 sm:$0xff]   ;;  %v740_v12 = vld [vmem:[#allocation2 + $0x64] ss:$8 sps:$4 sm:$0xff]   ;;  %v742_v13 = vld [vmem:[#allocation2 + $0x60] ss:$8 sps:$4 sm:$0xff]  }
  0x2b   :  { %v56_v14 = vld [vmem:[%s958_s0 + $0x8] sm:$0xff]  ;;  %v743_v15 = vld [vmem:[#allocation2 + $0x74] ss:$8 sps:$4 sm:$0xff]   ;;  %v770_v17 = vld [vmem:[#allocation4 + $0x40] sm:$0xff]   ;;  %v850_v52 = vmov 0.0   ;;  %v94_v54 = vshrl.u32 %v93_v53, 7 }
  0x2c   :  { %266 = vmatpush1.bf16.msra.mxu0 %v727_v3  ;;  %v58_v16 = vpack.c.bf16 %v56_v14, %v56_v14  ;;  %v771_v18 = vld [vmem:[#allocation4] sm:$0xff]   ;;  %v772_v19 = vld [vmem:[#allocation4 + $0x48] sm:$0xff]   ;;  %v745_v20 = vld [vmem:[#allocation2 + $0x70] ss:$8 sps:$4 sm:$0xff]   ;;  %663 = vmatprep.subr.bf16.mxu1 %v770_v17  ;;  %vm851_vm0 = vmmov 0   ;;  %vm597_vm1 = vcmask 31744  }
  0x2d   :  { %267 = vmatprep.subr.bf16.mxu0 %v728_v4  ;;  %664 = vmatpush3.bf16.msra.mxu1 %v771_v18  ;;  %v773_v21 = vld [vmem:[#allocation4 + $0x8] sm:$0xff]   ;;  %v774_v22 = vld [vmem:[#allocation4 + $0x50] sm:$0xff]   ;;  %v776_v26 = vld [vmem:[#allocation4 + $0x58] sm:$0xff]   ;;  %v95_v55 = vsub.s32 0, %v94_v54  ;;  %v99_v57 = vsub.s32 1, %v94_v54 }
  0x2e   :  { %295 = vmatprep.mubr.bf16.mxu0 %v58_v16  ;;  %665 = vmatprep.subr.bf16.mxu1 %v772_v19  ;;  %v746_v23 = vld [vmem:[#allocation2 + $0x84] ss:$8 sps:$4 sm:$0xff]   ;;  %v748_v24 = vld [vmem:[#allocation2 + $0x80] ss:$8 sps:$4 sm:$0xff]   ;;  %v775_v25 = vld [vmem:[#allocation4 + $0x10] sm:$0xff]  }
  0x2f   :  { %v749_v27 = vld [vmem:[#allocation2 + $0x94] ss:$8 sps:$4 sm:$0xff]   ;;  %v751_v28 = vld [vmem:[#allocation2 + $0x90] ss:$8 sps:$4 sm:$0xff]   ;;  %v752_v30 = vld [vmem:[#allocation2 + $0xa4] ss:$8 sps:$4 sm:$0xff]  }
  0x30   :  { %268 = vmatpush1.bf16.msra.mxu0 %v730_v5  ;;  %v777_v29 = vld [vmem:[#allocation4 + $0x18] sm:$0xff]   ;;  %v778_v31 = vld [vmem:[#allocation4 + $0x60] sm:$0xff]   ;;  %v780_v34 = vld [vmem:[#allocation4 + $0x68] sm:$0xff]  }
  0x31   :  { %269 = vmatprep.subr.bf16.mxu0 %v731_v6  ;;  %666 = vmatpush3.bf16.msra.mxu1 %v773_v21  ;;  %v779_v32 = vld [vmem:[#allocation4 + $0x20] sm:$0xff]   ;;  %v755_v35 = vld [vmem:[#allocation2 + $0xb4] ss:$8 sps:$4 sm:$0xff]   ;;  %v781_v36 = vld [vmem:[#allocation4 + $0x28] sm:$0xff]  }
  0x32   :  { %667 = vmatprep.subr.bf16.mxu1 %v774_v22  ;;  %v754_v33 = vld [vmem:[#allocation2 + $0xa0] ss:$8 sps:$4 sm:$0xff]   ;;  %v757_v37 = vld [vmem:[#allocation2 + $0xb0] ss:$8 sps:$4 sm:$0xff]   ;;  %v758_v38 = vld [vmem:[#allocation2 + $0xc4] ss:$8 sps:$4 sm:$0xff]  }
  0x33   :  { %v760_v39 = vld [vmem:[#allocation2 + $0xc0] ss:$8 sps:$4 sm:$0xff]   ;;  %v761_v40 = vld [vmem:[#allocation2 + $0xd4] ss:$8 sps:$4 sm:$0xff]   ;;  %v763_v41 = vld [vmem:[#allocation2 + $0xd0] ss:$8 sps:$4 sm:$0xff]  }
  0x34   :  { %270 = vmatpush1.bf16.msra.mxu0 %v733_v7  ;;  %v764_v42 = vld [vmem:[#allocation2 + $0xe4] ss:$8 sps:$4 sm:$0xff]   ;;  %v766_v43 = vld [vmem:[#allocation2 + $0xe0] ss:$8 sps:$4 sm:$0xff]   ;;  %v767_v44 = vld [vmem:[#allocation2 + $0xf4] ss:$8 sps:$4 sm:$0xff]  }
  0x35   :  { %271 = vmatprep.subr.bf16.mxu0 %v734_v8  ;;  %668 = vmatpush3.bf16.msra.mxu1 %v775_v25  ;;  %v769_v45 = vld [vmem:[#allocation2 + $0xf0] ss:$8 sps:$4 sm:$0xff]   ;;  %v55_v46 = vld [vmem:[%s958_s0] sm:$0xff]  ;;  %v787_v7 = vld [vmem:[%s963_s5 + $0x8] sm:$0xff]  }
  0x36   :  { %669 = vmatprep.subr.bf16.mxu1 %v776_v26  ;;  %v57_v47 = vpack.c.bf16 %v55_v46, %v55_v46  ;;  %v782_v48 = vld [vmem:[#allocation4 + $0x70] sm:$0xff]   ;;  %v784_v50 = vld [vmem:[#allocation4 + $0x78] sm:$0xff]   ;;  %v91_v56 = vld [vmem:[%s960_s2] sm:$0x3] }
  0x37   :  { %v783_v49 = vld [vmem:[#allocation4 + $0x30] sm:$0xff]   ;;  %v785_v51 = vld [vmem:[#allocation4 + $0x38] sm:$0xff]   ;;  %v96_v58 = vrot.slane %v91_v56, %v95_v55  ;;  %v100_v59 = vrot.slane %v91_v56, %v99_v57  ;;  %v786_v5 = vld [vmem:[%s963_s5] sm:$0xff]  }
  0x38   :  { %272 = vmatpush1.bf16.msra.mxu0 %v736_v9  ;;  %v788_v8 = vld [vmem:[%s963_s5 + $0x10] sm:$0xff]   ;;  %v789_v9 = vld [vmem:[%s963_s5 + $0x18] sm:$0xff]  }
  0x39   :  { %273 = vmatprep.subr.bf16.mxu0 %v737_v10  ;;  %670 = vmatpush3.bf16.msra.mxu1 %v777_v29  ;;  %v790_v10 = vld [vmem:[%s963_s5 + $0x20] sm:$0xff]  }
  0x3a   :  { %671 = vmatprep.subr.bf16.mxu1 %v778_v31 }
  0x3c   :  { %274 = vmatpush1.bf16.msra.mxu0 %v739_v11  ;;  %v791_v11 = vld [vmem:[%s963_s5 + $0x28] sm:$0xff]  }
  0x3d   :  { %275 = vmatprep.subr.bf16.mxu0 %v740_v12  ;;  %672 = vmatpush3.bf16.msra.mxu1 %v779_v32  ;;  %v792_v12 = vld [vmem:[%s963_s5 + $0x30] sm:$0xff]  }
  0x3e   :  { %673 = vmatprep.subr.bf16.mxu1 %v780_v34 }
  0x40   :  { %276 = vmatpush1.bf16.msra.mxu0 %v742_v13  ;;  %v793_v13 = vld [vmem:[%s963_s5 + $0x38] sm:$0xff]  }
  0x41   :  { %277 = vmatprep.subr.bf16.mxu0 %v743_v15  ;;  %674 = vmatpush3.bf16.msra.mxu1 %v781_v36  ;;  %v637_v15 = vld [vmem:[%s962_s4] ss:$0 sm:$0xff] }
  0x42   :  { %675 = vmatprep.subr.bf16.mxu1 %v782_v48 }
  0x44   :  { %278 = vmatpush1.bf16.msra.mxu0 %v745_v20 }
  0x45   :  { %279 = vmatprep.subr.bf16.mxu0 %v746_v23  ;;  %676 = vmatpush3.bf16.msra.mxu1 %v783_v49  ;;  %v654_v23 = vld [vmem:[%s964_s6] ss:$0 sm:$0xff] }
  0x46   :  { %677 = vmatprep.subr.bf16.mxu1 %v784_v50 }
  0x48   :  { %280 = vmatpush1.bf16.msra.mxu0 %v748_v24 }
  0x49   :  { %281 = vmatprep.subr.bf16.mxu0 %v749_v27  ;;  %678 = vmatpush3.bf16.msra.mxu1 %v785_v51 }
  0x4a   :  { %694 = vmatprep.subr.bf16.mxu1 %v850_v52 }
  0x4c   :  { %282 = vmatpush1.bf16.msra.mxu0 %v751_v28 }
  0x4d   :  { %283 = vmatprep.subr.bf16.mxu0 %v752_v30 }
  0x50   :  { %284 = vmatpush1.bf16.msra.mxu0 %v754_v33 }
  0x51   :  { %285 = vmatprep.subr.bf16.mxu0 %v755_v35 }
  0x54   :  { %286 = vmatpush1.bf16.msra.mxu0 %v757_v37 }
  0x55   :  { %287 = vmatprep.subr.bf16.mxu0 %v758_v38 }
  0x58   :  { %288 = vmatpush1.bf16.msra.mxu0 %v760_v39 }
  0x59   :  { %289 = vmatprep.subr.bf16.mxu0 %v761_v40 }
  0x5c   :  { %290 = vmatpush1.bf16.msra.mxu0 %v763_v41 }
  0x5d   :  { %291 = vmatprep.subr.bf16.mxu0 %v764_v42 }
  0x60   :  { %292 = vmatpush1.bf16.msra.mxu0 %v766_v43 }
  0x61   :  { %293 = vmatprep.subr.bf16.mxu0 %v767_v44 }
  0x64   :  { %294 = vmatpush1.bf16.msra.mxu0 %v769_v45 }
  0x67   :  { %296 = vmatmul.mubr.bf16.vlgmr.msra.gmra.mrb[0].mxu0 %v57_v47 }
 0x13a   :  { %v297_v60 = vpop.f32.mrb[0].mxu0 }
 0x13b   :  { %v298_v61 = vadd.f32 %v297_v60, %v96_v58  ;;  %v299_v62 = vpop.f32.mrb[1].mxu0 }
 0x13c   :  { %v300_v63 = vadd.f32 %v299_v62, %v100_v59  ;;  %v301_v0 = vpop.f32.mrb[2].mxu0 }
 0x13d   :  { %v304_v1 = vmax.f32 %v298_v61, 0.0  ;;  %v302_v2 = vpop.f32.mrb[3].mxu0 }
 0x13e   :  { %v305_v3 = vmax.f32 %v300_v63, 0.0 }
 0x13f   :  { %v306_v6 = vpack.c.bf16 %v304_v1, %v304_v1 }
 0x140   :  { %v307_v4 = vpack.c.bf16 %v305_v3, %v305_v3 }
 0x142   :  { %475 = vmatprep.mubr.bf16.mxu1 %v307_v4 }
 0x143   :  { %476 = vmatmul.mubr.bf16.vlgmr.msra.gmra.mrb[0].mxu1 %v306_v6 }
 0x144   :  { %695 = vmatpush3.bf16.msra.mxu1 %v786_v5  ;;  %710 = vmatprep.mubr.msk.bf16.mxu1 %vm851_vm0, %v850_v52 }
 0x145   :  { %696 = vmatprep.subr.bf16.mxu1 %v850_v52 }
 0x148   :  { %697 = vmatpush3.bf16.msra.mxu1 %v787_v7 }
 0x149   :  { %698 = vmatprep.subr.bf16.mxu1 %v850_v52 }
 0x14c   :  { %699 = vmatpush3.bf16.msra.mxu1 %v788_v8 }
 0x14d   :  { %700 = vmatprep.subr.bf16.mxu1 %v850_v52 }
 0x150   :  { %701 = vmatpush3.bf16.msra.mxu1 %v789_v9 }
 0x151   :  { %702 = vmatprep.subr.bf16.mxu1 %v850_v52 }
 0x154   :  { %703 = vmatpush3.bf16.msra.mxu1 %v790_v10 }
 0x155   :  { %704 = vmatprep.subr.bf16.mxu1 %v850_v52 }
 0x158   :  { %705 = vmatpush3.bf16.msra.mxu1 %v791_v11 }
 0x159   :  { %706 = vmatprep.subr.bf16.mxu1 %v850_v52 }
 0x15c   :  { %707 = vmatpush3.bf16.msra.mxu1 %v792_v12 }
 0x15d   :  { %708 = vmatprep.subr.bf16.mxu1 %v850_v52 }
 0x160   :  { %709 = vmatpush3.bf16.msra.mxu1 %v793_v13 }
 0x216   :  { %v679_v14 = vpop.f32.mrb[0].mxu1 }
 0x217   :  { %v680_v16 = vpop.f32.mrb[1].mxu1 }
 0x218   :  { %v681_v17 = vadd.f32 %v680_v16, %v679_v14  ;;  %v682_v18 = vpop.f32.mrb[2].mxu1 }
 0x219   :  { %v683_v19 = vpop.f32.mrb[3].mxu1 }
 0x21a   :  { %v478_v20 = vadd.f32 %v681_v17, %v637_v15 }
 0x21c   :  { %v483_v21 = vmax.f32 %v478_v20, 0.0 }
 0x21e   :  { %v484_v22 = vpack.c.bf16 %v483_v21, %v483_v21 }
 0x220   :  { %711 = vmatmul.mubr.bf16.vlgmr.msra.gmra.mrb[4].mxu1 %v484_v22 }
 0x2f3   :  { %v590_v24 = vpop.f32.mrb[4].mxu1 }
 0x2f4   :  { %v591_v25 = vadd.f32 %v654_v23, %v590_v24  ;;  %v712_v26 = vpop.f32.mrb[5].mxu1 }
 0x2f5   :  { %v593_v27 = vpop.f32.mrb[6].mxu1 }
 0x2f6   :  { %794 = vtanh.f32 %v591_v25  ;;  %v713_v28 = vpop.f32.mrb[7].mxu1 }
 0x300   :  { %v795_v29 = vpop.eup %794 }
 0x301   :  { %598 = vst.msk [vmem:[%s965_s7] sm:$0xff] %vm597_vm1, %v795_v29 }
 0x302   :  { %603 = vsyncpa [#allocation3], 1 }
 0x303   :  { %604 = vsyncpa [#allocation5], 1 }

</bundles_post_ra>
